<compile_context>
chip_gen: v7x
topology: tpu7x:2x2x1
jax: 0.10.0
libtpu: 0.0.40
codegen_flags: <defaults>
</compile_context>

<pallas_src>
import jax
import jax.numpy as jnp
from jax.experimental import pallas as pl
from jax.experimental.pallas import tpu as pltpu


# ----------------------------- helpers ---------------------------------------


def _round_up(n, m):
    return ((n + m - 1) // m) * m


def _pick_tile(n, preferred):
    """Largest power-of-two tile <= preferred that divides n (n % 128 == 0)."""
    t = 1
    while t * 2 <= preferred and n % (t * 2) == 0:
        t *= 2
    return t


# ----------------------------- kernels ---------------------------------------


def _gcn_relu_kernel(a_ref, di_ref, dk_ref, xw_ref, b_ref, h_ref, acc_ref):
    # a_ref : (TM, TK) raw adjacency tile (edge counts, self-loops included)
    # di_ref: (TM, 1)  D^{-1/2} for the rows of this tile
    # dk_ref: (1, TK)  D^{-1/2} for the contraction slice (columns)
    # xw_ref: (TK, F)  slice of X @ W^T
    # b_ref : (1, F)   bias
    # h_ref : (TM, F)  output tile (resident across the k axis)
    # acc_ref: (TM, F) f32 accumulator scratch
    k = pl.program_id(1)

    @pl.when(k == 0)
    def _():
        acc_ref[...] = jnp.zeros_like(acc_ref)

    # Fused GCN normalization on the VPU: A_hat_tile = dinv_i * A_tile * dinv_k
    a_hat = a_ref[...] * di_ref[...] * dk_ref[...]
    acc_ref[...] += jnp.dot(a_hat, xw_ref[...], preferred_element_type=jnp.float32)

    @pl.when(k == pl.num_programs(1) - 1)
    def _():
        h = acc_ref[...] + b_ref[...]
        # TODO(synk): dropout is identity here (eval mode).
        h_ref[...] = jnp.maximum(h, 0.0).astype(h_ref.dtype)


def _gram_kernel(hi_ref, hj_ref, o_ref):
    # hi_ref: (TI, F), hj_ref: (TJ, F)  ->  o_ref[i, j] = H_i @ H_j^T
    # NT contraction handled directly by the MXU; no in-kernel transpose.
    o_ref[...] = jax.lax.dot_general(
        hi_ref[...], hj_ref[...],
        dimension_numbers=(((1,), (1,)), ((), ())),
        preferred_element_type=jnp.float32,
    ).astype(o_ref.dtype)


# ----------------------------- wrapper ----------------------------------------


def structure_decoder(x, edge_index, weight, bias):
    """x: (N, F) node features; edge_index: (2, E) int32.  Returns (N, N)."""
    N, F = x.shape
    Np = _round_up(max(N, 8), 128)  # lane-aligned padded node count

    # ---- tiny wrapper precomputation (no dense N^2 passes) -------------------
    xw = x.astype(jnp.float32) @ weight.astype(jnp.float32).T        # (N, F)
    xw = jnp.pad(xw, ((0, Np - N), (0, 0)))
    b = bias.reshape(1, F).astype(jnp.float32)

    # Raw dense adjacency (with self-loops) built by ONE scatter directly into
    # the padded zero buffer; D^{-1/2} normalization is applied in-kernel.
    src = edge_index[0].astype(jnp.int32)
    dst = edge_index[1].astype(jnp.int32)
    loop = jnp.arange(N, dtype=jnp.int32)
    src_all = jnp.concatenate([src, loop])
    dst_all = jnp.concatenate([dst, loop])
    a_raw = jnp.zeros((Np, Np), jnp.float32).at[dst_all, src_all].add(1.0)

    deg = jnp.zeros((Np,), jnp.float32).at[dst_all].add(1.0)         # in-degree + 1
    dinv = jnp.where(deg > 0, jax.lax.rsqrt(deg), 0.0)
    dinv_col = dinv.reshape(Np, 1)   # scales the rows of an A tile   (index i)
    dinv_row = dinv.reshape(1, Np)   # scales the columns of an A tile (index k)

    # ---- stage 1: H = relu(A_hat @ (X @ W^T) + b), K-tiled over N ------------
    tm = _pick_tile(Np, min(256, Np // 2) if Np >= 256 else Np)
    tk = _pick_tile(Np, min(512, Np))
    gm, gk = Np // tm, Np // tk

    h = pl.pallas_call(
        _gcn_relu_kernel,
        out_shape=jax.ShapeDtypeStruct((Np, F), jnp.float32),
        grid=(gm, gk),
        in_specs=[
            pl.BlockSpec((tm, tk), lambda i, k: (i, k)),   # raw adjacency tile
            pl.BlockSpec((tm, 1), lambda i, k: (i, 0)),    # dinv rows
            pl.BlockSpec((1, tk), lambda i, k: (0, k)),    # dinv cols
            pl.BlockSpec((tk, F), lambda i, k: (k, 0)),    # X @ W^T slice
            pl.BlockSpec((1, F), lambda i, k: (0, 0)),     # bias
        ],
        out_specs=pl.BlockSpec((tm, F), lambda i, k: (i, 0)),
        scratch_shapes=[pltpu.VMEM((tm, F), jnp.float32)],
        compiler_params=pltpu.CompilerParams(
            dimension_semantics=("parallel", "arbitrary")),
    )(a_raw, dinv_col, dinv_row, xw, b)

    # ---- stage 2: Out = H @ H^T (NT contraction, no wrapper transpose) -------
    t2 = _pick_tile(Np, min(512, Np // 2) if Np >= 256 else Np)
    g2 = Np // t2

    out = pl.pallas_call(
        _gram_kernel,
        out_shape=jax.ShapeDtypeStruct((Np, Np), jnp.float32),
        grid=(g2, g2),
        in_specs=[
            pl.BlockSpec((t2, F), lambda i, j: (i, 0)),
            pl.BlockSpec((t2, F), lambda i, j: (j, 0)),
        ],
        out_specs=pl.BlockSpec((t2, t2), lambda i, j: (i, j)),
        compiler_params=pltpu.CompilerParams(
            dimension_semantics=("parallel", "parallel")),
    )(h, h)

    return out[:N, :N] if Np != N else out


# ----------------------------- reference --------------------------------------


def reference(x, edge_index, weight, bias):
    """Pure-JAX reproduction of the PyTorch forward (eval mode)."""
    N = x.shape[0]
    src, dst = edge_index[0], edge_index[1]
    a = jnp.zeros((N, N), jnp.float32).at[dst, src].add(1.0)
    a = a + jnp.eye(N, dtype=jnp.float32)
    deg = jnp.sum(a, axis=1)
    dinv = jnp.where(deg > 0, jax.lax.rsqrt(deg), 0.0)
    a_hat = a * dinv[:, None] * dinv[None, :]
    h = jax.nn.relu(a_hat @ (x @ weight.T) + bias)
    # dropout identity in eval mode
    return h @ h.T


# ----------------------------- demo / check -----------------------------------


if __name__ == "__main__":
    N_NODES, NHID, DROPOUT = 16, 32, 0.1

    # Deterministic small graph: ring + chords, undirected (both directions).
    idx = jnp.arange(N_NODES, dtype=jnp.int32)
    ring_src = jnp.concatenate([idx, (idx + 1) % N_NODES])
    ring_dst = jnp.concatenate([(idx + 1) % N_NODES, idx])
    chord_src = jnp.concatenate([idx, (idx + 5) % N_NODES])
    chord_dst = jnp.concatenate([(idx + 5) % N_NODES, idx])
    edge_index = jnp.stack([jnp.concatenate([ring_src, chord_src]),
                            jnp.concatenate([ring_dst, chord_dst])])   # (2, 64)

    key = jax.random.PRNGKey(0)
    kx, kw, kb = jax.random.split(key, 3)
    x = jax.random.normal(kx, (N_NODES, NHID), jnp.float32)
    weight = 0.2 * jax.random.normal(kw, (NHID, NHID), jnp.float32)   # GCNConv lin.weight
    bias = 0.1 * jax.random.normal(kb, (NHID,), jnp.float32)          # GCNConv bias

    out = structure_decoder(x, edge_index, weight, bias)
    out = jax.block_until_ready(out)

    ref = reference(x, edge_index, weight, bias)
    assert out.shape == (N_NODES, N_NODES), out.shape
    max_err = float(jnp.max(jnp.abs(out - ref)))
    if max_err > 1e-3:
        raise AssertionError(f"kernel/reference mismatch: max_err={max_err}")

    print("KERNEL_OK")
</pallas_src>

<mosaic_0001>
module attributes {stable_mosaic.version = 11 : i64} {
  func.func @_gcn_relu_kernel(%arg0: i32, %arg1: i32, %arg2: memref<128x128xf32, #tpu.memory_space<vmem>>, %arg3: memref<128x1xf32, #tpu.memory_space<vmem>>, %arg4: memref<1x128xf32, #tpu.memory_space<vmem>>, %arg5: memref<128x32xf32, #tpu.memory_space<vmem>>, %arg6: memref<1x32xf32, #tpu.memory_space<vmem>>, %arg7: memref<128x32xf32, #tpu.memory_space<vmem>>, %arg8: memref<128x32xf32, #tpu.memory_space<vmem>>) attributes {dimension_semantics = [#tpu.dimension_semantics<parallel>, #tpu.dimension_semantics<arbitrary>], iteration_bounds = array<i64: 1, 1>, scalar_prefetch = 0 : i64, scratch_operands = 1 : i64, tpu.core_type = #tpu.core_type<tc>, window_params = [{transform_indices = @transform_0, window_bounds = array<i64: 128, 128>}, {transform_indices = @transform_1, window_bounds = array<i64: 128, 1>}, {transform_indices = @transform_2, window_bounds = array<i64: 1, 128>}, {transform_indices = @transform_3, window_bounds = array<i64: 128, 32>}, {pipeline_mode = #tpu.pipeline_mode<synchronous>, transform_indices = @transform_4, window_bounds = array<i64: 1, 32>}, {transform_indices = @transform_5, window_bounds = array<i64: 128, 32>}]} {
    %c0_i32 = arith.constant 0 : i32
    %0 = arith.cmpi eq, %arg1, %c0_i32 : i32
    %1 = arith.extui %0 : i1 to i32
    %c0_i32_0 = arith.constant 0 : i32
    %2 = arith.cmpi ne, %1, %c0_i32_0 : i32
    scf.if %2 {
      %cst_14 = arith.constant 0.000000e+00 : f32
      %18 = vector.broadcast %cst_14 : f32 to vector<128x32xf32>
      %c0_15 = arith.constant 0 : index
      %c0_16 = arith.constant 0 : index
      %19 = vector.load %arg8[%c0_15, %c0_16] : memref<128x32xf32, #tpu.memory_space<vmem>>, vector<128x32xf32>
      tpu.vector_store %arg8[%c0_15, %c0_16], %18 {strides = array<i32>} : memref<128x32xf32, #tpu.memory_space<vmem>>, vector<128x32xf32>,
    } else {
    }
    %c0 = arith.constant 0 : index
    %c0_1 = arith.constant 0 : index
    %3 = vector.load %arg2[%c0, %c0_1] : memref<128x128xf32, #tpu.memory_space<vmem>>, vector<128x128xf32>
    %c0_2 = arith.constant 0 : index
    %c0_3 = arith.constant 0 : index
    %4 = vector.load %arg3[%c0_2, %c0_3] : memref<128x1xf32, #tpu.memory_space<vmem>>, vector<128x1xf32>
    %5 = vector.broadcast %4 : vector<128x1xf32> to vector<128x128xf32>
    %6 = arith.mulf %3, %5 : vector<128x128xf32>
    %c0_4 = arith.constant 0 : index
    %c0_5 = arith.constant 0 : index
    %7 = vector.load %arg4[%c0_4, %c0_5] : memref<1x128xf32, #tpu.memory_space<vmem>>, vector<1x128xf32>
    %8 = vector.broadcast %7 : vector<1x128xf32> to vector<128x128xf32>
    %9 = arith.mulf %6, %8 : vector<128x128xf32>
    %c0_6 = arith.constant 0 : index
    %c0_7 = arith.constant 0 : index
    %10 = vector.load %arg8[%c0_6, %c0_7] : memref<128x32xf32, #tpu.memory_space<vmem>>, vector<128x32xf32>
    %c0_8 = arith.constant 0 : index
    %c0_9 = arith.constant 0 : index
    %11 = vector.load %arg5[%c0_8, %c0_9] : memref<128x32xf32, #tpu.memory_space<vmem>>, vector<128x32xf32>
    %cst = arith.constant dense<0.000000e+00> : vector<128x32xf32>
    %12 = tpu.matmul %9, %11, %cst {dimension_numbers = #tpu.dot_dimension_numbers<[1], [0], [0], [1], [0, 0, 1, 1], [], []>} : vector<128x128xf32>, vector<128x32xf32>, vector<128x32xf32> -> vector<128x32xf32>
    %13 = arith.addf %10, %12 : vector<128x32xf32>
    %c0_10 = arith.constant 0 : index
    %c0_11 = arith.constant 0 : index
    %14 = vector.load %arg8[%c0_10, %c0_11] : memref<128x32xf32, #tpu.memory_space<vmem>>, vector<128x32xf32>
    tpu.vector_store %arg8[%c0_10, %c0_11], %13 {strides = array<i32>} : memref<128x32xf32, #tpu.memory_space<vmem>>, vector<128x32xf32>,
    %c0_i32_12 = arith.constant 0 : i32
    %15 = arith.cmpi eq, %arg1, %c0_i32_12 : i32
    %16 = arith.extui %15 : i1 to i32
    %c0_i32_13 = arith.constant 0 : i32
    %17 = arith.cmpi ne, %16, %c0_i32_13 : i32
    scf.if %17 {
      %c0_14 = arith.constant 0 : index
      %c0_15 = arith.constant 0 : index
      %18 = vector.load %arg8[%c0_14, %c0_15] : memref<128x32xf32, #tpu.memory_space<vmem>>, vector<128x32xf32>
      %c0_16 = arith.constant 0 : index
      %c0_17 = arith.constant 0 : index
      %19 = vector.load %arg6[%c0_16, %c0_17] : memref<1x32xf32, #tpu.memory_space<vmem>>, vector<1x32xf32>
      %20 = vector.broadcast %19 : vector<1x32xf32> to vector<128x32xf32>
      %21 = arith.addf %18, %20 : vector<128x32xf32>
      %cst_18 = arith.constant 0.000000e+00 : f32
      %22 = vector.broadcast %cst_18 : f32 to vector<128x32xf32>
      %23 = arith.maximumf %21, %22 : vector<128x32xf32>
      %c0_19 = arith.constant 0 : index
      %c0_20 = arith.constant 0 : index
      %24 = vector.load %arg7[%c0_19, %c0_20] : memref<128x32xf32, #tpu.memory_space<vmem>>, vector<128x32xf32>
      tpu.vector_store %arg7[%c0_19, %c0_20], %23 {strides = array<i32>} : memref<128x32xf32, #tpu.memory_space<vmem>>, vector<128x32xf32>,
    } else {
    }
    return
  }
  func.func @transform_0(%arg0: i32, %arg1: i32) -> (i32, i32) {
    %c0_i32 = arith.constant 0 : i32
    return %arg0, %arg1 : i32, i32
  }
  func.func @transform_1(%arg0: i32, %arg1: i32) -> (i32, i32) {
    %c0_i32 = arith.constant 0 : i32
    %c0_i32_0 = arith.constant 0 : i32
    return %arg0, %c0_i32 : i32, i32
  }
  func.func @transform_2(%arg0: i32, %arg1: i32) -> (i32, i32) {
    %c0_i32 = arith.constant 0 : i32
    %c0_i32_0 = arith.constant 0 : i32
    return %c0_i32, %arg1 : i32, i32
  }
  func.func @transform_3(%arg0: i32, %arg1: i32) -> (i32, i32) {
    %c0_i32 = arith.constant 0 : i32
    %c0_i32_0 = arith.constant 0 : i32
    return %arg1, %c0_i32 : i32, i32
  }
  func.func @transform_4(%arg0: i32, %arg1: i32) -> (i32, i32) {
    %c0_i32 = arith.constant 0 : i32
    %c0_i32_0 = arith.constant 0 : i32
    %c0_i32_1 = arith.constant 0 : i32
    return %c0_i32, %c0_i32_0 : i32, i32
  }
  func.func @transform_5(%arg0: i32, %arg1: i32) -> (i32, i32) {
    %c0_i32 = arith.constant 0 : i32
    %c0_i32_0 = arith.constant 0 : i32
    return %arg0, %c0_i32 : i32, i32
  }
}

</mosaic_0001>

<bundles_post_ra>
// kernel: tpu_custom_call.1
= control target key start
LH: loop header
LB: loop body
LE: loop exit
PB: predicated region body
PF: predicated region fallthrough
CT: control target
= control target key end

     0   :  { %v622_v0 = vmov 0   ;;  %vm24_vm0 = vcmask 261120   ;;  %v623_v41 = vmov 0.0   ;;  %s936_s1 = inlined_call_operand.vmem [shape: f32[128,1], index: 1, kind: input, shape index: {}]   ;;  %s937_s3 = inlined_call_operand.vmem [shape: f32[128,32], index: 3, kind: input, shape index: {}]   ;;  %s938_s0 = inlined_call_operand.vmem [shape: f32[128,128], index: 0, kind: input, shape index: {}]   ;;  %s939_s2 = inlined_call_operand.vmem [shape: f32[1,128], index: 2, kind: input, shape index: {}]   ;;  %s940_s4 = inlined_call_operand.vmem [shape: f32[1,32], index: 4, kind: input, shape index: {}]   ;;  %s941_s5 = inlined_call_operand.vmem [shape: f32[128,32], index: 5, kind: output, shape index: {}]  }
   0x1   :  { %621 = vset.pattern.permute.xlu1 %v622_v0  ;;  %620 = vset.pattern.permute.xlu0 %v622_v0  ;;  %v58_v1 = vld [vmem:[%s936_s1 + $0x8] sm:$0xff]  ;;  %v57_v2 = vld [vmem:[%s936_s1] sm:$0xff]  ;;  %v67_v5 = vld [vmem:[%s936_s1 + $0x50] sm:$0xff]  ;;  %26 = vst.msk [vmem:[#allocation2 + $0x8] sm:$0xff] %vm24_vm0, %v623_v41 }
   0x2   :  { %80 = vperm.xlu1 %621, %v58_v1   ;;  %75 = vperm.xlu0 %620, %v57_v2   ;;  %v66_v3 = vld [vmem:[%s936_s1 + $0x48] sm:$0xff]  ;;  %v65_v4 = vld [vmem:[%s936_s1 + $0x40] sm:$0xff]  ;;  %v59_v8 = vld [vmem:[%s936_s1 + $0x10] sm:$0xff]  ;;  %25 = vst.msk [vmem:[#allocation2] sm:$0xff] %vm24_vm0, %v623_v41 }
   0x3   :  { %v208_v6 = vld [vmem:[%s937_s3] sm:$0xff]  ;;  %v209_v7 = vld [vmem:[%s937_s3 + $0x8] sm:$0xff]  ;;  %v210_v10 = vld [vmem:[%s937_s3 + $0x10] sm:$0xff]  ;;  %27 = vst.msk [vmem:[#allocation2 + $0x10] sm:$0xff] %vm24_vm0, %v623_v41 }
   0x4   :  { %v570_v9 = vpack.c.bf16 %v209_v7, %v208_v6  ;;  %v211_v11 = vld [vmem:[%s937_s3 + $0x18] sm:$0xff]  ;;  %v212_v13 = vld [vmem:[%s937_s3 + $0x20] sm:$0xff]  ;;  %v213_v14 = vld [vmem:[%s937_s3 + $0x28] sm:$0xff]  ;;  %28 = vst.msk [vmem:[#allocation2 + $0x18] sm:$0xff] %vm24_vm0, %v623_v41 }
   0x5   :  { %v574_v12 = vpack.c.bf16 %v211_v11, %v210_v10  ;;  %v68_v15 = vld [vmem:[%s936_s1 + $0x58] sm:$0xff]  ;;  %v578_v17 = vpack.c.bf16 %v213_v14, %v212_v13  ;;  %v214_v18 = vld [vmem:[%s937_s3 + $0x30] sm:$0xff]  ;;  %v69_v20 = vld [vmem:[%s936_s1 + $0x60] sm:$0xff]  ;;  %29 = vst.msk [vmem:[#allocation2 + $0x20] sm:$0xff] %vm24_vm0, %v623_v41 }
   0x6   :  { %120 = vperm.xlu1 %621, %v66_v3   ;;  %115 = vperm.xlu0 %620, %v65_v4   ;;  %v60_v16 = vld [vmem:[%s936_s1 + $0x18] sm:$0xff]  ;;  %v61_v21 = vld [vmem:[%s936_s1 + $0x20] sm:$0xff]  ;;  %v217_v24 = vld [vmem:[%s937_s3 + $0x48] sm:$0xff]  ;;  %30 = vst.msk [vmem:[#allocation2 + $0x28] sm:$0xff] %vm24_vm0, %v623_v41 }
   0x7   :  { %571 = vmatprep.subr.bf16.mxu0 %v570_v9  ;;  %602 = vmatprep.subr.bf16.mxu1 %v570_v9  ;;  %v215_v19 = vld [vmem:[%s937_s3 + $0x38] sm:$0xff]  ;;  %v216_v23 = vld [vmem:[%s937_s3 + $0x40] sm:$0xff]  ;;  %v70_v25 = vld [vmem:[%s936_s1 + $0x68] sm:$0xff]  ;;  %31 = vst.msk [vmem:[#allocation2 + $0x30] sm:$0xff] %vm24_vm0, %v623_v41 }
   0x8   :  { %573 = vmatpush3.bf16.msra.mxu0 %v570_v9  ;;  %610 = vmatpush3.bf16.msra.mxu1 %v570_v9  ;;  %v582_v22 = vpack.c.bf16 %v215_v19, %v214_v18  ;;  %v62_v26 = vld [vmem:[%s936_s1 + $0x28] sm:$0xff]  ;;  %v586_v27 = vpack.c.bf16 %v217_v24, %v216_v23  ;;  %v218_v28 = vld [vmem:[%s937_s3 + $0x50] sm:$0xff]  ;;  %v219_v29 = vld [vmem:[%s937_s3 + $0x58] sm:$0xff]  ;;  %32 = vst.msk [vmem:[#allocation2 + $0x38] sm:$0xff] %vm24_vm0, %v623_v41 }
   0x9   :  { %575 = vmatprep.subr.bf16.mxu0 %v574_v12  ;;  %603 = vmatprep.subr.bf16.mxu1 %v574_v12  ;;  %v71_v30 = vld [vmem:[%s936_s1 + $0x70] sm:$0xff]  ;;  %v590_v32 = vpack.c.bf16 %v219_v29, %v218_v28  ;;  %v220_v33 = vld [vmem:[%s937_s3 + $0x60] sm:$0xff]  ;;  %v221_v34 = vld [vmem:[%s937_s3 + $0x68] sm:$0xff]  ;;  %33 = vst.msk [vmem:[#allocation2 + $0x40] sm:$0xff] %vm24_vm0, %v623_v41 }
   0xa   :  { %125 = vperm.xlu1 %621, %v67_v5   ;;  %85 = vperm.xlu0 %620, %v59_v8   ;;  %v63_v31 = vld [vmem:[%s936_s1 + $0x30] sm:$0xff]  ;;  %v72_v35 = vld [vmem:[%s936_s1 + $0x78] sm:$0xff]  ;;  %v594_v37 = vpack.c.bf16 %v221_v34, %v220_v33  ;;  %34 = vst.msk [vmem:[#allocation2 + $0x48] sm:$0xff] %vm24_vm0, %v623_v41  ;;  %35 = vst.msk [vmem:[#allocation2 + $0x50] sm:$0xff] %vm24_vm0, %v623_v41 }
   0xb   :  { %v64_v36 = vld [vmem:[%s936_s1 + $0x38] sm:$0xff]  ;;  %v222_v38 = vld [vmem:[%s937_s3 + $0x70] sm:$0xff]  ;;  %36 = vst.msk [vmem:[#allocation2 + $0x58] sm:$0xff] %vm24_vm0, %v623_v41  ;;  %37 = vst.msk [vmem:[#allocation2 + $0x60] sm:$0xff] %vm24_vm0, %v623_v41 }
   0xc   :  { %577 = vmatpush3.bf16.msra.mxu0 %v574_v12  ;;  %611 = vmatpush3.bf16.msra.mxu1 %v574_v12  ;;  %v223_v39 = vld [vmem:[%s937_s3 + $0x78] sm:$0xff]  ;;  %38 = vst.msk [vmem:[#allocation2 + $0x68] sm:$0xff] %vm24_vm0, %v623_v41  ;;  %39 = vst.msk [vmem:[#allocation2 + $0x70] sm:$0xff] %vm24_vm0, %v623_v41  ;;  %v42_v42 = vld [vmem:[%s938_s0 + $0x8] sm:$0xff] }
   0xd   :  { %579 = vmatprep.subr.bf16.mxu0 %v578_v17  ;;  %604 = vmatprep.subr.bf16.mxu1 %v578_v17  ;;  %v598_v40 = vpack.c.bf16 %v223_v39, %v222_v38  ;;  %40 = vst.msk [vmem:[#allocation2 + $0x78] sm:$0xff] %vm24_vm0, %v623_v41  ;;  %v41_v43 = vld [vmem:[%s938_s0] sm:$0xff]  ;;  %v50_v49 = vld [vmem:[%s938_s0 + $0x48] sm:$0xff]  ;;  %v51_v57 = vld [vmem:[%s938_s0 + $0x50] sm:$0xff] }
   0xe   :  { %130 = vperm.xlu1 %621, %v68_v15   ;;  %90 = vperm.xlu0 %620, %v60_v16   ;;  %v775_v44 = vld [vmem:[%s939_s2] ss:$0 sm:$0xff]  ;;  %v43_v58 = vld [vmem:[%s938_s0 + $0x10] sm:$0xff]  ;;  %v52_v1 = vld [vmem:[%s938_s0 + $0x58] sm:$0xff] }
   0xf   :  { %v49_v50 = vld [vmem:[%s938_s0 + $0x40] sm:$0xff]  ;;  %v44_v2 = vld [vmem:[%s938_s0 + $0x18] sm:$0xff]  ;;  %v46_v18 = vld [vmem:[%s938_s0 + $0x28] sm:$0xff] }
  0x10   :  { %581 = vmatpush3.bf16.msra.mxu0 %v578_v17  ;;  %612 = vmatpush3.bf16.msra.mxu1 %v578_v17  ;;  %v53_v9 = vld [vmem:[%s938_s0 + $0x60] sm:$0xff]  ;;  %v54_v17 = vld [vmem:[%s938_s0 + $0x68] sm:$0xff]  ;;  %v56_v33 = vld [vmem:[%s938_s0 + $0x78] sm:$0xff] }
  0x11   :  { %583 = vmatprep.subr.bf16.mxu0 %v582_v22  ;;  %605 = vmatprep.subr.bf16.mxu1 %v582_v22  ;;  %v45_v10 = vld [vmem:[%s938_s0 + $0x20] sm:$0xff]  ;;  %v48_v34 = vld [vmem:[%s938_s0 + $0x38] sm:$0xff] }
  0x12   :  { %135 = vperm.xlu1 %621, %v69_v20   ;;  %95 = vperm.xlu0 %620, %v61_v21  }
  0x14   :  { %585 = vmatpush3.bf16.msra.mxu0 %v582_v22  ;;  %613 = vmatpush3.bf16.msra.mxu1 %v582_v22 }
  0x15   :  { %587 = vmatprep.subr.bf16.mxu0 %v586_v27  ;;  %606 = vmatprep.subr.bf16.mxu1 %v586_v27 }
  0x16   :  { %140 = vperm.xlu1 %621, %v70_v25   ;;  %100 = vperm.xlu0 %620, %v62_v26   ;;  %v55_v25 = vld [vmem:[%s938_s0 + $0x70] sm:$0xff] }
  0x17   :  { %v47_v26 = vld [vmem:[%s938_s0 + $0x30] sm:$0xff] }
  0x18   :  { %589 = vmatpush3.bf16.msra.mxu0 %v586_v27  ;;  %614 = vmatpush3.bf16.msra.mxu1 %v586_v27 }
  0x19   :  { %591 = vmatprep.subr.bf16.mxu0 %v590_v32  ;;  %607 = vmatprep.subr.bf16.mxu1 %v590_v32 }
  0x1a   :  { %145 = vperm.xlu1 %621, %v71_v30   ;;  %105 = vperm.xlu0 %620, %v63_v31  }
  0x1c   :  { %593 = vmatpush3.bf16.msra.mxu0 %v590_v32  ;;  %615 = vmatpush3.bf16.msra.mxu1 %v590_v32 }
  0x1d   :  { %595 = vmatprep.subr.bf16.mxu0 %v594_v37  ;;  %608 = vmatprep.subr.bf16.mxu1 %v594_v37 }
  0x1e   :  { %150 = vperm.xlu1 %621, %v72_v35   ;;  %110 = vperm.xlu0 %620, %v64_v36  }
  0x20   :  { %597 = vmatpush3.bf16.msra.mxu0 %v594_v37  ;;  %616 = vmatpush3.bf16.msra.mxu1 %v594_v37 }
  0x21   :  { %599 = vmatprep.subr.bf16.mxu0 %v598_v40  ;;  %609 = vmatprep.subr.bf16.mxu1 %v598_v40 }
  0x24   :  { %601 = vmatpush3.bf16.msra.mxu0 %v598_v40  ;;  %617 = vmatpush3.bf16.msra.mxu1 %v598_v40 }
  0x81   :  { %v81_v45 = vpop.permute.xlu1 %80  ;;  %v76_v46 = vpop.permute.xlu0 %75 }
  0x82   :  { %v154_v47 = vmul.f32 %v81_v45, %v42_v42  ;;  %v153_v48 = vmul.f32 %v76_v46, %v41_v43  ;;  %v193_v43 = vld [vmem:[#allocation2 + $0x8] sm:$0xff]  ;;  %v192_v45 = vld [vmem:[#allocation2] sm:$0xff] }
  0x84   :  { %v177_v51 = vmul.f32 %v775_v44, %v154_v47  ;;  %v176_v52 = vmul.f32 %v775_v44, %v153_v48 }
  0x85   :  { %v121_v53 = vpop.permute.xlu1 %120  ;;  %v116_v54 = vpop.permute.xlu0 %115 }
  0x86   :  { %v162_v55 = vmul.f32 %v121_v53, %v50_v49  ;;  %v161_v56 = vmul.f32 %v116_v54, %v49_v50  ;;  %546 = vmatprep.mubr.f32.mxu0 %v176_v52  ;;  %v201_v50 = vld [vmem:[#allocation2 + $0x48] sm:$0xff] }
  0x87   :  { %547 = vmatmul.mubr.f32.vlgmr.msra.gmra.mrb[0].mxu0 %v177_v51  ;;  %v200_v51 = vld [vmem:[#allocation2 + $0x40] sm:$0xff] }
  0x88   :  { %v185_v59 = vmul.f32 %v775_v44, %v162_v55  ;;  %v184_v60 = vmul.f32 %v775_v44, %v161_v56  ;;  %v195_v56 = vld [vmem:[#allocation2 + $0x18] sm:$0xff] }
  0x89   :  { %v126_v61 = vpop.permute.xlu1 %125  ;;  %v86_v62 = vpop.permute.xlu0 %85 }
  0x8a   :  { %v163_v63 = vmul.f32 %v126_v61, %v51_v57  ;;  %v155_v0 = vmul.f32 %v86_v62, %v43_v58  ;;  %558 = vmatprep.mubr.f32.mxu1 %v184_v60  ;;  %v203_v57 = vld [vmem:[#allocation2 + $0x58] sm:$0xff]  ;;  %v202_v60 = vld [vmem:[#allocation2 + $0x50] sm:$0xff] }
  0x8b   :  { %559 = vmatmul.mubr.f32.vlgmr.msra.gmra.mrb[0].mxu1 %v185_v59  ;;  %v194_v59 = vld [vmem:[#allocation2 + $0x10] sm:$0xff] }
  0x8c   :  { %v186_v3 = vmul.f32 %v775_v44, %v163_v63  ;;  %v178_v4 = vmul.f32 %v775_v44, %v155_v0 }
  0x8d   :  { %v131_v5 = vpop.permute.xlu1 %130  ;;  %v91_v6 = vpop.permute.xlu0 %90 }
  0x8e   :  { %v164_v7 = vmul.f32 %v131_v5, %v52_v1  ;;  %v156_v8 = vmul.f32 %v91_v6, %v44_v2  ;;  %549 = vmatprep.mubr.f32.mxu0 %v178_v4  ;;  %561 = vmatprep.mubr.f32.mxu1 %v186_v3 }
  0x90   :  { %v187_v11 = vmul.f32 %v775_v44, %v164_v7  ;;  %v179_v12 = vmul.f32 %v775_v44, %v156_v8 }
  0x91   :  { %v136_v13 = vpop.permute.xlu1 %135  ;;  %v96_v14 = vpop.permute.xlu0 %95 }
  0x92   :  { %v165_v15 = vmul.f32 %v136_v13, %v53_v9  ;;  %v157_v16 = vmul.f32 %v96_v14, %v45_v10  ;;  %550 = vmatmul.mubr.f32.gmra.mrb[2].mxu0 %v179_v12  ;;  %562 = vmatmul.mubr.f32.gmra.mrb[2].mxu1 %v187_v11 }
  0x94   :  { %v188_v19 = vmul.f32 %v775_v44, %v165_v15  ;;  %v180_v20 = vmul.f32 %v775_v44, %v157_v16  ;;  %v197_v15 = vld [vmem:[#allocation2 + $0x28] sm:$0xff] }
  0x95   :  { %v141_v21 = vpop.permute.xlu1 %140  ;;  %v101_v22 = vpop.permute.xlu0 %100  ;;  %v205_v16 = vld [vmem:[#allocation2 + $0x68] sm:$0xff] }
  0x96   :  { %v166_v23 = vmul.f32 %v141_v21, %v54_v17  ;;  %v158_v24 = vmul.f32 %v101_v22, %v46_v18  ;;  %552 = vmatprep.mubr.f32.mxu0 %v180_v20  ;;  %564 = vmatprep.mubr.f32.mxu1 %v188_v19  ;;  %v196_v18 = vld [vmem:[#allocation2 + $0x20] sm:$0xff] }
  0x97   :  { %v204_v19 = vld [vmem:[#allocation2 + $0x60] sm:$0xff] }
  0x98   :  { %v189_v27 = vmul.f32 %v775_v44, %v166_v23  ;;  %v181_v28 = vmul.f32 %v775_v44, %v158_v24 }
  0x99   :  { %v146_v29 = vpop.permute.xlu1 %145  ;;  %v106_v30 = vpop.permute.xlu0 %105 }
  0x9a   :  { %v167_v31 = vmul.f32 %v146_v29, %v55_v25  ;;  %v159_v32 = vmul.f32 %v106_v30, %v47_v26  ;;  %553 = vmatmul.mubr.f32.gmra.mrb[4].mxu0 %v181_v28  ;;  %565 = vmatmul.mubr.f32.gmra.mrb[4].mxu1 %v189_v27 }
  0x9c   :  { %v190_v35 = vmul.f32 %v775_v44, %v167_v31  ;;  %v182_v36 = vmul.f32 %v775_v44, %v159_v32 }
  0x9d   :  { %v151_v37 = vpop.permute.xlu1 %150  ;;  %v111_v38 = vpop.permute.xlu0 %110 }
  0x9e   :  { %v168_v39 = vmul.f32 %v151_v37, %v56_v33  ;;  %v160_v40 = vmul.f32 %v111_v38, %v48_v34  ;;  %555 = vmatprep.mubr.f32.mxu0 %v182_v36  ;;  %567 = vmatprep.mubr.f32.mxu1 %v190_v35 }
  0xa0   :  { %v191_v41 = vmul.f32 %v775_v44, %v168_v39  ;;  %v183_v42 = vmul.f32 %v775_v44, %v160_v40  ;;  %v841_v44 = vld [vmem:[%s940_s4] ss:$0 sm:$0xff]  ;;  %v199_v40 = vld [vmem:[#allocation2 + $0x38] sm:$0xff] }
  0xa2   :  { %556 = vmatmul.mubr.f32.gmra.mrb[6].mxu0 %v183_v42  ;;  %568 = vmatmul.mubr.f32.gmra.mrb[6].mxu1 %v191_v41  ;;  %v207_v41 = vld [vmem:[#allocation2 + $0x78] sm:$0xff]  ;;  %v198_v42 = vld [vmem:[#allocation2 + $0x30] sm:$0xff] }
 0x15a   :  { %v548_v46 = vpop.f32.mrb[0].mxu0 }
 0x15b   :  { %v370_v47 = vadd.f32 %v548_v46, %v193_v43  ;;  %v290_v48 = vpop.f32.mrb[1].mxu0  ;;  %v206_v43 = vld [vmem:[#allocation2 + $0x70] sm:$0xff] }
 0x15c   :  { %v369_v49 = vadd.f32 %v290_v48, %v192_v45 }
 0x15d   :  { %387 = vst.msk [vmem:[#allocation2 + $0x8] sm:$0xff] %vm24_vm0, %v370_v47 }
 0x15e   :  { %386 = vst.msk [vmem:[#allocation2] sm:$0xff] %vm24_vm0, %v369_v49  ;;  %v560_v52 = vpop.f32.mrb[0].mxu1 }
 0x15f   :  { %v378_v53 = vadd.f32 %v560_v52, %v201_v50  ;;  %v330_v54 = vpop.f32.mrb[1].mxu1 }
 0x160   :  { %v377_v55 = vadd.f32 %v330_v54, %v200_v51 }
 0x161   :  { %395 = vst.msk [vmem:[#allocation2 + $0x48] sm:$0xff] %vm24_vm0, %v378_v53 }
 0x162   :  { %394 = vst.msk [vmem:[#allocation2 + $0x40] sm:$0xff] %vm24_vm0, %v377_v55 }
 0x164   :  { %v406_v58 = vld [vmem:[#allocation2 + $0x8] sm:$0xff] }
 0x165   :  { %v429_v61 = vadd.f32 %v841_v44, %v406_v58  ;;  %v405_v62 = vld [vmem:[#allocation2] sm:$0xff]  ;;  %v551_v63 = vpop.f32.mrb[2].mxu0  ;;  %v563_v0 = vpop.f32.mrb[2].mxu1 }
 0x166   :  { %v428_v1 = vadd.f32 %v841_v44, %v405_v62  ;;  %v372_v2 = vadd.f32 %v551_v63, %v195_v56  ;;  %v380_v3 = vadd.f32 %v563_v0, %v203_v57  ;;  %v300_v4 = vpop.f32.mrb[3].mxu0  ;;  %v340_v5 = vpop.f32.mrb[3].mxu1 }
 0x167   :  { %v445_v6 = vmax.f32 %v429_v61, 0.0  ;;  %v371_v7 = vadd.f32 %v300_v4, %v194_v59  ;;  %v379_v8 = vadd.f32 %v340_v5, %v202_v60 }
 0x168   :  { %v444_v9 = vmax.f32 %v428_v1, 0.0  ;;  %v414_v10 = vld [vmem:[#allocation2 + $0x48] sm:$0xff]  ;;  %389 = vst.msk [vmem:[#allocation2 + $0x18] sm:$0xff] %vm24_vm0, %v372_v2  ;;  %397 = vst.msk [vmem:[#allocation2 + $0x58] sm:$0xff] %vm24_vm0, %v380_v3 }
 0x169   :  { %461 = vst.msk [vmem:[%s941_s5 + $0x8] sm:$0xff] %vm24_vm0, %v445_v6  ;;  %v437_v11 = vadd.f32 %v841_v44, %v414_v10  ;;  %v413_v12 = vld [vmem:[#allocation2 + $0x40] sm:$0xff]  ;;  %388 = vst.msk [vmem:[#allocation2 + $0x10] sm:$0xff] %vm24_vm0, %v371_v7 }
 0x16a   :  { %396 = vst.msk [vmem:[#allocation2 + $0x50] sm:$0xff] %vm24_vm0, %v379_v8  ;;  %460 = vst.msk [vmem:[%s941_s5] sm:$0xff] %vm24_vm0, %v444_v9  ;;  %v436_v13 = vadd.f32 %v841_v44, %v413_v12 }
 0x16b   :  { %v453_v14 = vmax.f32 %v437_v11, 0.0 }
 0x16c   :  { %v452_v17 = vmax.f32 %v436_v13, 0.0 }
 0x16d   :  { %469 = vst.msk [vmem:[%s941_s5 + $0x48] sm:$0xff] %vm24_vm0, %v453_v14  ;;  %v554_v20 = vpop.f32.mrb[4].mxu0  ;;  %v566_v21 = vpop.f32.mrb[4].mxu1 }
 0x16e   :  { %468 = vst.msk [vmem:[%s941_s5 + $0x40] sm:$0xff] %vm24_vm0, %v452_v17  ;;  %v374_v22 = vadd.f32 %v554_v20, %v197_v15  ;;  %v382_v23 = vadd.f32 %v566_v21, %v205_v16  ;;  %v310_v24 = vpop.f32.mrb[5].mxu0  ;;  %v350_v25 = vpop.f32.mrb[5].mxu1 }
 0x16f   :  { %v408_v26 = vld [vmem:[#allocation2 + $0x18] sm:$0xff]  ;;  %v373_v28 = vadd.f32 %v310_v24, %v196_v18  ;;  %v381_v29 = vadd.f32 %v350_v25, %v204_v19 }
 0x170   :  { %v416_v27 = vld [vmem:[#allocation2 + $0x58] sm:$0xff]  ;;  %v431_v30 = vadd.f32 %v841_v44, %v408_v26  ;;  %v407_v32 = vld [vmem:[#allocation2 + $0x10] sm:$0xff]  ;;  %391 = vst.msk [vmem:[#allocation2 + $0x28] sm:$0xff] %vm24_vm0, %v374_v22  ;;  %399 = vst.msk [vmem:[#allocation2 + $0x68] sm:$0xff] %vm24_vm0, %v382_v23 }
 0x171   :  { %v439_v31 = vadd.f32 %v841_v44, %v416_v27  ;;  %v415_v33 = vld [vmem:[#allocation2 + $0x50] sm:$0xff]  ;;  %v430_v34 = vadd.f32 %v841_v44, %v407_v32  ;;  %390 = vst.msk [vmem:[#allocation2 + $0x20] sm:$0xff] %vm24_vm0, %v373_v28  ;;  %398 = vst.msk [vmem:[#allocation2 + $0x60] sm:$0xff] %vm24_vm0, %v381_v29 }
 0x172   :  { %v438_v35 = vadd.f32 %v841_v44, %v415_v33  ;;  %v447_v36 = vmax.f32 %v431_v30, 0.0 }
 0x173   :  { %v455_v37 = vmax.f32 %v439_v31, 0.0  ;;  %v446_v38 = vmax.f32 %v430_v34, 0.0 }
 0x174   :  { %v454_v39 = vmax.f32 %v438_v35, 0.0  ;;  %463 = vst.msk [vmem:[%s941_s5 + $0x18] sm:$0xff] %vm24_vm0, %v447_v36 }
 0x175   :  { %471 = vst.msk [vmem:[%s941_s5 + $0x58] sm:$0xff] %vm24_vm0, %v455_v37  ;;  %462 = vst.msk [vmem:[%s941_s5 + $0x10] sm:$0xff] %vm24_vm0, %v446_v38  ;;  %v557_v45 = vpop.f32.mrb[6].mxu0  ;;  %v569_v46 = vpop.f32.mrb[6].mxu1 }
 0x176   :  { %470 = vst.msk [vmem:[%s941_s5 + $0x50] sm:$0xff] %vm24_vm0, %v454_v39  ;;  %v376_v47 = vadd.f32 %v557_v45, %v199_v40  ;;  %v384_v48 = vadd.f32 %v569_v46, %v207_v41  ;;  %v320_v49 = vpop.f32.mrb[7].mxu0  ;;  %v360_v50 = vpop.f32.mrb[7].mxu1 }
 0x177   :  { %v410_v51 = vld [vmem:[#allocation2 + $0x28] sm:$0xff]  ;;  %v375_v53 = vadd.f32 %v320_v49, %v198_v42  ;;  %v383_v54 = vadd.f32 %v360_v50, %v206_v43 }
 0x178   :  { %v418_v52 = vld [vmem:[#allocation2 + $0x68] sm:$0xff]  ;;  %v433_v55 = vadd.f32 %v841_v44, %v410_v51  ;;  %v409_v57 = vld [vmem:[#allocation2 + $0x20] sm:$0xff]  ;;  %393 = vst.msk [vmem:[#allocation2 + $0x38] sm:$0xff] %vm24_vm0, %v376_v47  ;;  %401 = vst.msk [vmem:[#allocation2 + $0x78] sm:$0xff] %vm24_vm0, %v384_v48 }
 0x179   :  { %v441_v56 = vadd.f32 %v841_v44, %v418_v52  ;;  %v417_v58 = vld [vmem:[#allocation2 + $0x60] sm:$0xff]  ;;  %v432_v59 = vadd.f32 %v841_v44, %v409_v57  ;;  %392 = vst.msk [vmem:[#allocation2 + $0x30] sm:$0xff] %vm24_vm0, %v375_v53  ;;  %400 = vst.msk [vmem:[#allocation2 + $0x70] sm:$0xff] %vm24_vm0, %v383_v54 }
 0x17a   :  { %v440_v60 = vadd.f32 %v841_v44, %v417_v58  ;;  %v449_v61 = vmax.f32 %v433_v55, 0.0 }
 0x17b   :  { %v457_v62 = vmax.f32 %v441_v56, 0.0  ;;  %v448_v63 = vmax.f32 %v432_v59, 0.0 }
 0x17c   :  { %v456_v0 = vmax.f32 %v440_v60, 0.0  ;;  %465 = vst.msk [vmem:[%s941_s5 + $0x28] sm:$0xff] %vm24_vm0, %v449_v61 }
 0x17d   :  { %473 = vst.msk [vmem:[%s941_s5 + $0x68] sm:$0xff] %vm24_vm0, %v457_v62  ;;  %464 = vst.msk [vmem:[%s941_s5 + $0x20] sm:$0xff] %vm24_vm0, %v448_v63 }
 0x17e   :  { %472 = vst.msk [vmem:[%s941_s5 + $0x60] sm:$0xff] %vm24_vm0, %v456_v0 }
 0x17f   :  { %v412_v1 = vld [vmem:[#allocation2 + $0x38] sm:$0xff] }
 0x180   :  { %v420_v2 = vld [vmem:[#allocation2 + $0x78] sm:$0xff]  ;;  %v435_v3 = vadd.f32 %v841_v44, %v412_v1  ;;  %v411_v5 = vld [vmem:[#allocation2 + $0x30] sm:$0xff] }
 0x181   :  { %v443_v4 = vadd.f32 %v841_v44, %v420_v2  ;;  %v419_v6 = vld [vmem:[#allocation2 + $0x70] sm:$0xff]  ;;  %v434_v7 = vadd.f32 %v841_v44, %v411_v5 }
 0x182   :  { %v442_v8 = vadd.f32 %v841_v44, %v419_v6  ;;  %v451_v9 = vmax.f32 %v435_v3, 0.0 }
 0x183   :  { %v459_v10 = vmax.f32 %v443_v4, 0.0  ;;  %v450_v11 = vmax.f32 %v434_v7, 0.0 }
 0x184   :  { %v458_v12 = vmax.f32 %v442_v8, 0.0  ;;  %467 = vst.msk [vmem:[%s941_s5 + $0x38] sm:$0xff] %vm24_vm0, %v451_v9 }
 0x185   :  { %475 = vst.msk [vmem:[%s941_s5 + $0x78] sm:$0xff] %vm24_vm0, %v459_v10  ;;  %466 = vst.msk [vmem:[%s941_s5 + $0x30] sm:$0xff] %vm24_vm0, %v450_v11 }
 0x186   :  { %474 = vst.msk [vmem:[%s941_s5 + $0x70] sm:$0xff] %vm24_vm0, %v458_v12 }

</bundles_post_ra>
